<compile_context>
chip_gen: v5e
topology: v5e:2x2
jax: 0.10.0
libtpu: 0.0.40
codegen_flags: <defaults>
</compile_context>

<pallas_src>
import jax
import jax.numpy as jnp
from jax.experimental import pallas as pl
from jax.experimental.pallas import tpu as pltpu

LANES = 128
SUBLANES = 8


# ---------------------------------------------------------------------------
# Deterministic parameter initialization (mirrors ScalingLaw.__init__/reinit)
# ---------------------------------------------------------------------------
def make_ranges(for_prune: bool):
    ranges = [
        [x * 10 for x in range(3)],   # logA candidates
        [x for x in range(2)],        # logE candidates
        [x / 2 for x in range(3)],    # exponent 0 candidates
    ]
    if for_prune:
        ranges.append([-x / 2 for x in range(2)])  # exponent 1 candidates
    return ranges


def get_indices(index: int, ranges):
    indices = []
    for r in reversed(ranges):
        index, i = divmod(index, len(r))
        indices.append(i)
    return indices[::-1]


def init_variables(index: int, for_prune: bool = True) -> jnp.ndarray:
    ranges = make_ranges(for_prune)
    idx = get_indices(index, ranges)
    vals = [ranges[i][idx[i]] for i in range(len(ranges))]
    return jnp.asarray(vals, dtype=jnp.float32)


def search_size(for_prune: bool = True) -> int:
    size = 1
    for r in make_ranges(for_prune):
        size *= len(r)
    return size


# ---------------------------------------------------------------------------
# Layout helpers
# ---------------------------------------------------------------------------
def _cdiv(a, b):
    return (a + b - 1) // b


def _round_up(a, b):
    return _cdiv(a, b) * b


def _choose_tile_rows(rows_needed: int, max_tile_rows: int) -> int:
    # Tile rows must be a multiple of 8 for (8,128)-dense blocks.
    max_tile_rows = max(SUBLANES, (max_tile_rows // SUBLANES) * SUBLANES)
    return min(max_tile_rows, _round_up(max(rows_needed, 1), SUBLANES))


def _to_slabs(x: jnp.ndarray, tile_rows: int):
    """Pad (K, N) to whole (tile_rows, 128) slabs -> (K, R, 128), R, N_pad."""
    K, N = x.shape
    rows_needed = _cdiv(N, LANES)
    rows_total = _round_up(max(rows_needed, 1), tile_rows)
    n_pad = rows_total * LANES
    if n_pad != N:
        # Pad with 1.0 so log() of the tail lanes is exactly 0 (no NaN/Inf);
        # padded outputs are discarded by the wrapper-side slice.
        x = jnp.pad(x, ((0, 0), (0, n_pad - N)), constant_values=1.0)
    return x.reshape(K, rows_total, LANES), rows_total, n_pad


# ---------------------------------------------------------------------------
# Single-candidate kernel: one parameter vector, tiled over N
# ---------------------------------------------------------------------------
def scaling_law_kernel(params_ref, x_ref, out_ref):
    # params_ref: SMEM (2+K,) f32 = [logA, exp(logE), a_0, ..., a_{K-1}]
    # x_ref     : VMEM (K, TILE_R, 128) f32
    # out_ref   : VMEM (TILE_R, 128) f32
    K = x_ref.shape[0]
    logA = params_ref[0]
    expE = params_ref[1]                        # exp(logE), hoisted in wrapper
    exps = params_ref[2] * jnp.log(x_ref[0])    # dense (TILE_R, 128) slab
    for k in range(1, K):                       # K is tiny & static -> unrolled
        exps = exps + params_ref[2 + k] * jnp.log(x_ref[k])
    out_ref[...] = jnp.exp(logA - exps) + expE


def scaling_law_forward(variables: jnp.ndarray, x: jnp.ndarray,
                        *, max_tile_rows: int = 1024) -> jnp.ndarray:
    """variables: (2+K,) f32; x: (K, N) f32 > 0  ->  (N,) f32."""
    K, N = x.shape
    assert variables.shape[0] == K + 2
    tile_rows = _choose_tile_rows(_cdiv(N, LANES), max_tile_rows)
    x3, rows_total, n_pad = _to_slabs(x, tile_rows)
    # Hoist exp(logE): one scalar exp outside the kernel.
    params = variables.astype(jnp.float32).at[1].set(jnp.exp(variables[1]))

    out = pl.pallas_call(
        scaling_law_kernel,
        out_shape=jax.ShapeDtypeStruct((rows_total, LANES), jnp.float32),
        grid_spec=pltpu.PrefetchScalarGridSpec(
            num_scalar_prefetch=1,
            grid=(rows_total // tile_rows,),
            in_specs=[
                pl.BlockSpec((K, tile_rows, LANES), lambda i, p: (0, i, 0)),
            ],
            out_specs=pl.BlockSpec((tile_rows, LANES), lambda i, p: (i, 0)),
        ),
        compiler_params=pltpu.CompilerParams(
            dimension_semantics=("parallel",)),
    )(params, x3)
    return out.reshape(n_pad)[:N]


# ---------------------------------------------------------------------------
# Batched-candidate kernel: all C grid-search inits share one x / log(x) load
# ---------------------------------------------------------------------------
def scaling_law_batched_kernel(params_ref, x_ref, out_ref):
    # params_ref: SMEM (C*(2+K),) f32, candidate c at [c*(2+K):(c+1)*(2+K)]
    #             with slot 1 already exponentiated (expE).
    # x_ref     : VMEM (K, TILE_R, 128) f32
    # out_ref   : VMEM (C, TILE_R, 128) f32
    K = x_ref.shape[0]
    C = out_ref.shape[0]
    stride = 2 + K
    # log(x): computed once per tile, reused by every candidate.
    logx = [jnp.log(x_ref[k]) for k in range(K)]
    for c in range(C):                           # static unroll over candidates
        base = c * stride
        exps = params_ref[base + 2] * logx[0]
        for k in range(1, K):
            exps = exps + params_ref[base + 2 + k] * logx[k]
        out_ref[c] = jnp.exp(params_ref[base] - exps) + params_ref[base + 1]


def scaling_law_forward_batched(variables: jnp.ndarray, x: jnp.ndarray,
                                *, vmem_budget_bytes: int = 8 << 20) -> jnp.ndarray:
    """variables: (C, 2+K) f32; x: (K, N) f32 > 0  ->  (C, N) f32."""
    C, P = variables.shape
    K, N = x.shape
    assert P == K + 2
    # Size the tile so (K input + C output slabs) * double-buffer fits budget
    # (conservative for v5e's 16 MiB / v7x's smaller VMEM).
    bytes_per_row = (K + C) * LANES * 4 * 2
    max_tile_rows = max(SUBLANES, vmem_budget_bytes // bytes_per_row)
    tile_rows = _choose_tile_rows(_cdiv(N, LANES), max_tile_rows)
    x3, rows_total, n_pad = _to_slabs(x, tile_rows)
    params = variables.astype(jnp.float32)
    params = params.at[:, 1].set(jnp.exp(params[:, 1])).reshape(-1)

    out = pl.pallas_call(
        scaling_law_batched_kernel,
        out_shape=jax.ShapeDtypeStruct((C, rows_total, LANES), jnp.float32),
        grid_spec=pltpu.PrefetchScalarGridSpec(
            num_scalar_prefetch=1,
            grid=(rows_total // tile_rows,),
            in_specs=[
                pl.BlockSpec((K, tile_rows, LANES), lambda i, p: (0, i, 0)),
            ],
            out_specs=pl.BlockSpec((C, tile_rows, LANES),
                                   lambda i, p: (0, i, 0)),
        ),
        compiler_params=pltpu.CompilerParams(
            dimension_semantics=("parallel",)),
    )(params, x3)
    return out.reshape(C, n_pad)[:, :N]


# ---------------------------------------------------------------------------
# Pure-JAX references
# ---------------------------------------------------------------------------
def scaling_law_ref(variables, x):
    exps = jnp.sum(variables[2:][:, None] * jnp.log(x), axis=0)
    return jnp.exp(variables[0] - exps) + jnp.exp(variables[1])


def scaling_law_ref_batched(variables, x):
    exps = variables[:, 2:] @ jnp.log(x)                       # (C, N)
    return jnp.exp(variables[:, :1] - exps) + jnp.exp(variables[:, 1:2])


# TODO(synk): optimize()/optimize_from_init() (LBFGS + HuberLoss search) and
# draw_plt() are host-side driver code around forward and are not kernelized.

if __name__ == "__main__":
    key = jax.random.PRNGKey(0)
    K, N = 2, 256                 # for_prune=True -> K = 2 exponent terms
    # Positive inputs (log must be defined), e.g. model / data sizes.
    x = jax.random.uniform(key, (K, N), dtype=jnp.float32,
                           minval=1.0, maxval=100.0)

    # --- single candidate (ScalingLaw.forward) ---
    # init index 21 -> variables = [10., 1., 0.5, -0.5]
    variables = init_variables(21, for_prune=True)
    out = jax.block_until_ready(scaling_law_forward(variables, x))
    ref = scaling_law_ref(variables, x)
    assert out.shape == (N,)
    assert jnp.allclose(out, ref, rtol=1e-4, atol=1e-5), (
        f"single: max abs err {jnp.max(jnp.abs(out - ref))}")

    # --- all grid-search candidates in one launch (x / log(x) reused) ---
    C = search_size(for_prune=True)   # 36 candidate inits
    all_vars = jnp.stack([init_variables(i, for_prune=True) for i in range(C)])
    out_b = jax.block_until_ready(scaling_law_forward_batched(all_vars, x))
    ref_b = scaling_law_ref_batched(all_vars, x)
    assert out_b.shape == (C, N)
    assert jnp.allclose(out_b, ref_b, rtol=1e-4, atol=1e-5), (
        f"batched: max abs err {jnp.max(jnp.abs(out_b - ref_b))}")

    print("KERNEL_OK")
</pallas_src>

<mosaic_0001>
module attributes {stable_mosaic.version = 11 : i64} {
  func.func @scaling_law_kernel(%arg0: i32, %arg1: memref<4xf32, #tpu.memory_space<smem>>, %arg2: memref<2x8x128xf32, #tpu.memory_space<vmem>>, %arg3: memref<8x128xf32, #tpu.memory_space<vmem>>) attributes {dimension_semantics = [#tpu.dimension_semantics<parallel>], iteration_bounds = array<i64: 1>, scalar_prefetch = 1 : i64, scratch_operands = 0 : i64, tpu.core_type = #tpu.core_type<tc>, window_params = [{transform_indices = @transform_0, window_bounds = array<i64: 2, 8, 128>}, {transform_indices = @transform_1, window_bounds = array<i64: 8, 128>}]} {
    %c0 = arith.constant 0 : index
    %0 = memref.load %arg1[%c0] : memref<4xf32, #tpu.memory_space<smem>>
    %c1 = arith.constant 1 : index
    %1 = memref.load %arg1[%c1] : memref<4xf32, #tpu.memory_space<smem>>
    %c2 = arith.constant 2 : index
    %2 = memref.load %arg1[%c2] : memref<4xf32, #tpu.memory_space<smem>>
    %c0_0 = arith.constant 0 : index
    %c0_1 = arith.constant 0 : index
    %c0_2 = arith.constant 0 : index
    %3 = vector.load %arg2[%c0_0, %c0_1, %c0_2] : memref<2x8x128xf32, #tpu.memory_space<vmem>>, vector<1x8x128xf32>
    %4 = vector.shape_cast %3 : vector<1x8x128xf32> to vector<8x128xf32>
    %5 = math.log %4 : vector<8x128xf32>
    %6 = vector.broadcast %2 : f32 to vector<8x128xf32>
    %7 = arith.mulf %6, %5 : vector<8x128xf32>
    %c3 = arith.constant 3 : index
    %8 = memref.load %arg1[%c3] : memref<4xf32, #tpu.memory_space<smem>>
    %c1_3 = arith.constant 1 : index
    %c0_4 = arith.constant 0 : index
    %c0_5 = arith.constant 0 : index
    %9 = vector.load %arg2[%c1_3, %c0_4, %c0_5] : memref<2x8x128xf32, #tpu.memory_space<vmem>>, vector<1x8x128xf32>
    %10 = vector.shape_cast %9 : vector<1x8x128xf32> to vector<8x128xf32>
    %11 = math.log %10 : vector<8x128xf32>
    %12 = vector.broadcast %8 : f32 to vector<8x128xf32>
    %13 = arith.mulf %12, %11 : vector<8x128xf32>
    %14 = arith.addf %7, %13 : vector<8x128xf32>
    %15 = vector.broadcast %0 : f32 to vector<8x128xf32>
    %16 = arith.subf %15, %14 : vector<8x128xf32>
    %17 = math.exp %16 : vector<8x128xf32>
    %18 = vector.broadcast %1 : f32 to vector<8x128xf32>
    %19 = arith.addf %17, %18 : vector<8x128xf32>
    %c0_6 = arith.constant 0 : index
    %c0_7 = arith.constant 0 : index
    %20 = vector.load %arg3[%c0_6, %c0_7] : memref<8x128xf32, #tpu.memory_space<vmem>>, vector<8x128xf32>
    tpu.vector_store %arg3[%c0_6, %c0_7], %19 {strides = array<i32>} : memref<8x128xf32, #tpu.memory_space<vmem>>, vector<8x128xf32>,
    return
  }
  func.func @transform_0(%arg0: i32, %arg1: memref<4xf32, #tpu.memory_space<smem>>) -> (i32, i32, i32) {
    %c0_i32 = arith.constant 0 : i32
    %c0_i32_0 = arith.constant 0 : i32
    %c0_i32_1 = arith.constant 0 : i32
    return %c0_i32, %arg0, %c0_i32_0 : i32, i32, i32
  }
  func.func @transform_1(%arg0: i32, %arg1: memref<4xf32, #tpu.memory_space<smem>>) -> (i32, i32) {
    %c0_i32 = arith.constant 0 : i32
    %c0_i32_0 = arith.constant 0 : i32
    return %arg0, %c0_i32 : i32, i32
  }
}

</mosaic_0001>

<bundles_post_ra>
// kernel: tpu_custom_call.1
= control target key start
LH: loop header
LB: loop body
LE: loop exit
PB: predicated region body
PF: predicated region fallthrough
CT: control target
= control target key end

     0   :  { %s154_s12 = smov [#allocation3]   ;;  %s183_s0 = inlined_call_operand.hbm [shape: f32[4], index: 0, kind: input, shape index: {}]   ;;  %s184_s1 = inlined_call_operand.hbm [shape: f32[2,8,128], index: 1, kind: input, shape index: {}]   ;;  %s185_s2 = inlined_call_operand.hbm [shape: f32[8,128], index: 2, kind: output, shape index: {}]  }
   0x1   :  { %s8_s11 = sshll.u32 %s183_s0, 4  ;;  %s9_s11 = int_to_ptr.hbm [resolvable:$true] %s8_s11 }
   0x2   :  { %11 = dma.hbm_to_smem %s9_s11, 16, %s154_s12, [#allocation2] }
   0x3   :  { %148 = dma.done.wait [#allocation2], 16 }
   0x4   :  { %149 = vsyncadd [#allocation2], 4294967280 }
   0x5   :  { %14 = sfence }
   0x6   :  { %15 = vsyncpa [#allocation5], 0 }
   0x7   :  { %16 = vsyncpa [#allocation6], 0  ;;  %s21_s15 = sshll.u32 %s184_s1, 4  ;;  %s155_s16 = smov [#allocation4]   ;;  %s22_s15 = int_to_ptr.hbm [resolvable:$true] %s21_s15 }
   0x8   :  { %s23_s17 = sshll.u32 %s155_s16, 4  ;;  %s156_s18 = smov 128   ;;  %s24_s17 = int_to_ptr.vmem [resolvable:$true] %s23_s17 }
   0x9   :  { %s157_s19 = smov 8  }
   0xa   :  { %29 = dma.hbm_to_vmem [thread:$0]  %s22_s15, 256, %s24_s17, [#allocation5], %s156_s18, %s156_s18, %s157_s19  }
   0xb   :  { %150 = dma.done.wait [#allocation5], 256  }
   0xc   :  { %151 = vsyncadd [#allocation5], 4294967040  ;;  %s75_s0 = sld [smem:[#allocation3 + $0x2]]  ;;  %v37_v0 = vld [vmem:[#allocation4] sm:$0xff]  ;;  %v44_v1 = vld [vmem:[#allocation4 + $0x8] sm:$0xff]  ;;  %s158_s22 = smov [#allocation7]  }
   0xd   :  { %s76_s20 = sld [smem:[#allocation3 + $0x3]]  ;;  %82 = vlog2.f32 %v37_v0  ;;  %s62_s23 = sshll.u32 %s158_s22, 4  ;;  %s63_s23 = int_to_ptr.vmem [resolvable:$true] %s62_s23 }
   0xe   :  { %84 = vlog2.f32 %v44_v1  ;;  %s34_s21 = sld [smem:[#allocation3]]  ;;  %s64_s26 = sshll.u32 %s185_s2, 4  ;;  %s65_s26 = int_to_ptr.hbm [resolvable:$true] %s64_s26 }
   0xf   :  { %s74_s1 = sld [smem:[#allocation3 + $0x1]] }
  0x12   :  { %v40_v3 = vstv %s75_s0 }
  0x13   :  { %v83_v2 = vpop.eup %82  ;;  %v47_v6 = vstv %s76_s20 }
  0x14   :  { %v85_v4 = vpop.eup %84  ;;  %v39_v5 = vmul.f32 0.6931472, %v83_v2  ;;  %v50_v10 = vstv %s34_s21 }
  0x15   :  { %v46_v7 = vmul.f32 0.6931472, %v85_v4  ;;  %v54_v14 = vstv %s74_s1 }
  0x16   :  { %v41_v8 = vmul.f32 %v40_v3, %v39_v5 }
  0x17   :  { %v48_v9 = vmul.f32 %v47_v6, %v46_v7 }
  0x19   :  { %v49_v11 = vadd.f32 %v48_v9, %v41_v8 }
  0x1b   :  { %v51_v12 = vsub.f32 %v50_v10, %v49_v11 }
  0x1d   :  { %v52_v13 = vmul.f32 1.442695, %v51_v12 }
  0x1f   :  { %86 = vpow2.f32 %v52_v13 }
  0x25   :  { %v87_v15 = vpop.eup %86 }
  0x26   :  { %v55_v16 = vadd.f32 %v87_v15, %v54_v14 }
  0x28   :  { %56 = vst [vmem:[#allocation7] sm:$0xff] %v55_v16 }
  0x29   :  { %67 = dma.vmem_to_hbm [thread:$0]  %s63_s23, 128, %s65_s26, [#allocation6]  }
  0x2a   :  { %152 = dma.done.wait [#allocation6], 128  }
  0x2b   :  { %153 = vsyncadd [#allocation6], 4294967168 }
  0x2c   :  { %72 = vsyncpa [#allocation5], 1 }
  0x2d   :  { %73 = vsyncpa [#allocation6], 1 }

</bundles_post_ra>
